<compile_context>
chip_gen: v5e
topology: v5e:2x2
jax: 0.10.0
libtpu: 0.0.40
codegen_flags: <defaults>
</compile_context>

<pallas_src>
import jax
import jax.numpy as jnp
from jax.experimental import pallas as pl
from jax.experimental.pallas import tpu as pltpu


# Budget for the pipelined blocks: (in + out) x double buffering.
_BLOCK_VMEM_BUDGET = 24 * 1024 * 1024
# Explicit scoped-VMEM limit: > v5e's 16 MiB default, < v7x's 64 MiB physical.
_VMEM_LIMIT_BYTES = 32 * 1024 * 1024


def _round_up(x, m):
    return ((x + m - 1) // m) * m


def _unembed_kernel(x_ref, o_ref):
    # x_ref: (tl, C) row tile of x[b];  o_ref: (C, tl) column tile of out[b].
    # Single XLU transpose per tile; the kernel is HBM-bandwidth bound.
    o_ref[...] = x_ref[...].T


def _pick_l_tile(seq_len, c, itemsize, batch):
    """Largest 128-multiple L tile whose pipelined blocks fit the VMEM budget."""
    # C is lane-padded to a 128 multiple inside the (tl, C) input tile in VMEM.
    lane_c = max(_round_up(c, 128), 128)
    # Bytes per L row across (in + out) blocks x double buffering.
    per_row = 4 * lane_c * itemsize
    tl = (_BLOCK_VMEM_BUDGET // per_row) // 128 * 128
    tl = max(min(tl, 8192), 128)  # legality floor / diminishing-returns cap
    if batch == 1:
        # v7x megacore: guarantee >= 2 blocks along a parallel grid axis.
        tl = min(tl, max(_round_up(pl.cdiv(seq_len, 2), 128), 128))
    if tl >= seq_len:
        # Full-extent block: always a legal block shape and within budget here.
        tl = seq_len
    return tl


def patch_unembed(x, x_size):
    """x: (B, H*W, C), x_size=(H, W) -> (B, C, H, W). Matches PatchUnEmbed.forward."""
    h, w = x_size
    b, seq_len, c = x.shape
    assert seq_len == h * w, "input feature has wrong size"

    itemsize = jnp.dtype(x.dtype).itemsize
    tl = _pick_l_tile(seq_len, c, itemsize, b)
    grid = (b, pl.cdiv(seq_len, tl))

    out = pl.pallas_call(
        _unembed_kernel,
        out_shape=jax.ShapeDtypeStruct((b, c, seq_len), x.dtype),
        grid_spec=pltpu.PrefetchScalarGridSpec(
            num_scalar_prefetch=0,
            grid=grid,
            in_specs=[
                # Batch dim squeezed; stream (tl, C) row tiles of x[b].
                pl.BlockSpec((None, tl, c), lambda bi, li: (bi, li, 0)),
            ],
            # Write (C, tl) blocks of the transposed output (lane-dense last dim).
            out_specs=pl.BlockSpec((None, c, tl), lambda bi, li: (bi, 0, li)),
        ),
        compiler_params=pltpu.CompilerParams(
            dimension_semantics=("parallel", "parallel"),
            vmem_limit_bytes=_VMEM_LIMIT_BYTES,
        ),
        cost_estimate=pl.CostEstimate(
            flops=0,
            transcendentals=0,
            bytes_accessed=2 * b * seq_len * c * itemsize,
        ),
    )(x)

    # (B, C, L) -> (B, C, H, W): contiguous reshape, no data movement.
    return out.reshape(b, c, h, w)


def _reference(x, x_size):
    h, w = x_size
    b, _, c = x.shape
    return jnp.transpose(x, (0, 2, 1)).reshape(b, c, h, w)


if __name__ == "__main__":
    key = jax.random.PRNGKey(0)
    key0, key1 = jax.random.split(key)

    # SRFormer-like small demo: embed_dim=96, 16x16 feature map, batch 2.
    b, h, w, embed_dim = 2, 16, 16, 96
    x = jax.random.normal(key0, (b, h * w, embed_dim), dtype=jnp.float32)

    out = jax.block_until_ready(patch_unembed(x, (h, w)))
    ref = _reference(x, (h, w))
    assert out.shape == (b, embed_dim, h, w)
    assert jnp.array_equal(out, ref)  # pure permutation -> bit-exact

    # batch == 1 path: exercises the >=2 L-tiles (megacore) split.
    x1 = jax.random.normal(key1, (1, 32 * 32, 64), dtype=jnp.float32)
    out1 = jax.block_until_ready(patch_unembed(x1, (32, 32)))
    assert jnp.array_equal(out1, _reference(x1, (32, 32)))

    print("KERNEL_OK")
</pallas_src>

<mosaic_0001>
module attributes {stable_mosaic.version = 11 : i64} {
  func.func @_unembed_kernel(%arg0: i32, %arg1: i32, %arg2: memref<1x256x96xf32, #tpu.memory_space<vmem>>, %arg3: memref<1x96x256xf32, #tpu.memory_space<vmem>>) attributes {dimension_semantics = [#tpu.dimension_semantics<parallel>, #tpu.dimension_semantics<parallel>], iteration_bounds = array<i64: 2, 1>, scalar_prefetch = 0 : i64, scratch_operands = 0 : i64, tpu.core_type = #tpu.core_type<tc>, window_params = [{transform_indices = @transform_0, window_bounds = array<i64: 1, 256, 96>}, {transform_indices = @transform_1, window_bounds = array<i64: 1, 96, 256>}]} {
    %c0 = arith.constant 0 : index
    %c0_0 = arith.constant 0 : index
    %c0_1 = arith.constant 0 : index
    %0 = vector.load %arg2[%c0, %c0_0, %c0_1] : memref<1x256x96xf32, #tpu.memory_space<vmem>>, vector<1x256x96xf32>
    %1 = vector.shape_cast %0 : vector<1x256x96xf32> to vector<256x96xf32>
    %2 = tpu.transpose %1, [1, 0] : vector<256x96xf32> -> vector<96x256xf32>
    %c0_2 = arith.constant 0 : index
    %c0_3 = arith.constant 0 : index
    %c0_4 = arith.constant 0 : index
    %3 = vector.load %arg3[%c0_2, %c0_3, %c0_4] : memref<1x96x256xf32, #tpu.memory_space<vmem>>, vector<1x96x256xf32>
    %4 = vector.shape_cast %3 : vector<1x96x256xf32> to vector<96x256xf32>
    %5 = vector.shape_cast %2 : vector<96x256xf32> to vector<1x96x256xf32>
    tpu.vector_store %arg3[%c0_2, %c0_3, %c0_4], %5 {strides = array<i32>} : memref<1x96x256xf32, #tpu.memory_space<vmem>>, vector<1x96x256xf32>,
    return
  }
  func.func @transform_0(%arg0: i32, %arg1: i32) -> (i32, i32, i32) {
    %c0_i32 = arith.constant 0 : i32
    %c0_i32_0 = arith.constant 0 : i32
    return %arg0, %arg1, %c0_i32 : i32, i32, i32
  }
  func.func @transform_1(%arg0: i32, %arg1: i32) -> (i32, i32, i32) {
    %c0_i32 = arith.constant 0 : i32
    %c0_i32_0 = arith.constant 0 : i32
    return %arg0, %c0_i32, %arg1 : i32, i32, i32
  }
}

</mosaic_0001>

<bundles_post_ra>
// kernel: tpu_custom_call.1
= control target key start
LH: loop header
LB: loop body
LE: loop exit
PB: predicated region body
PF: predicated region fallthrough
CT: control target
= control target key end

     0   :  { %6 = vsyncpa [#allocation3], 0  ;;  %s687_s0 = inlined_call_operand.vmem [shape: f32[2,256,96], index: 0, kind: input, shape index: {}]   ;;  %s688_s1 = inlined_call_operand.hbm [shape: f32[2,96,256], index: 1, kind: output, shape index: {}]  }
   0x1   :  { %8 = vsyncpa [#allocation3 + $0x1], 0  ;;  %s525_s6 = smov 0   ;;  %s527_s7 = smov 0  }
   0x2   :  { %s529_s8 = smov 0   ;;  %s531_s9 = smov 0  }
   0x3   :  { %s533_s10 = smov 0   ;;  %s535_s11 = smov 0  }
   0x4 LB: > { %s363_s12 = sadd.s32 4294967295, %s511_s11   ;;  %s364_s13 = sadd.s32 4294967294, %s511_s11   ;;  %s511_s11 = sphi %s535_s11, %s14_s11   ;;  %s507_s10 = sphi %s533_s10, %s695_s10   ;;  %s503_s9 = sphi %s531_s9, %s694_s9   ;;  %s499_s8 = sphi %s529_s8, %s693_s8   ;;  %s495_s7 = sphi %s527_s7, %s692_s7   ;;  %s491_s6 = sphi %s525_s6, %s691_s6  }
   0x5   : > { %s26_s14 = sadd.s32 1, %s507_s10  ;;  %s63_s15 = sadd.s32 1, %s499_s8 }
   0x6   : > { %p28_p0 = scmp.ge.s32.totalorder %s26_s14, 2  ;;  %p73_p1 = scmp.ne.s32.totalorder %s499_s8, %s495_s7 }
   0x7   : > { %p74_p2 = scmp.eq.s32.totalorder %s363_s12, 1  ;;  %p79_p3 = scmp.ne.s32.totalorder %s495_s7, %s491_s6 }
   0x8   : > { %s697_s14 = smov (%p28_p0, %s26_s14), 0  ;;  %p80_p5 = scmp.eq.s32.totalorder %s364_s13, 1 }
   0x9   : > { %p565_p4 = por %p74_p2, %p73_p1  ;;  %s58_s17 = ssub.s32 %s507_s10, %s697_s14 }
   0xa   : > { %p367_p6 = scmp.ge.s32.totalorder %s511_s11, 1  ;;  %p61_p7 = scmp.eq.s32.totalorder %s58_s17, 0 }
   0xb   : > { %p572_p8 = por %p80_p5, %p79_p3  ;;  %p111_p9 = scmp.lt.s32.totalorder %s511_s11, 3 }
   0xc   : > { %s578_s19 = scalar_select %p61_p7, %s499_s8, %s63_s15  }
   0xd   : > { %p112_p10 = pnand %p367_p6, %p111_p9 }
   0xe   : > { %p136_p11 = scmp.lt.s32.totalorder (!%p112_p10), %s503_s9, 1  ;;  %s132_s25 = sand.u32 (!%p112_p10), 1, %s495_s7  }
   0xf   : > { %115 = sbr.rel (%p112_p10) target bundleno = 283 (0x11b), region = 24  ;;  %s267_s5 = scalar_lea.sflag (!%p112_p10), [#allocation3], %s132_s25 }
  0x10   : > { %s374_s26 = smul.u32 (!%p112_p10), 192, %s132_s25  ;;  %s453_s17 = scalar_lea.hbm (!%p112_p10), %s688_s1, 384 }
  0x11   : > { %s375_s28 = smul.u32 (!%p112_p10), 192, %s503_s9 }
  0x12   : > { %s622_s27 = scalar_lea.vmem (!%p112_p10), [#allocation2], %s374_s26 }
  0x13   : > { %s280_s2 = scalar_lea.hbm (!%p112_p10), %s688_s1, %s375_s28  ;;  %s281_s3 = sshll.u32 (!%p112_p10), %s622_s27, 4  ;;  %s282_s3 = int_to_ptr.vmem [resolvable:$true] %s281_s3 }
  0x14   : > { %s137_s20 = scalar_select %p136_p11, %s503_s9, 1 }
  0x15   : > { %s283_s4 = sshll.u32 %s280_s2, 4  ;;  %s284_s4 = int_to_ptr.hbm [resolvable:$true] %s283_s4 }
  0x16   : > { %s373_s21 = sshll.u32 %s137_s20, 8  ;;  %s447_s9 = sshra.s32 %s284_s4, 4  ;;  %s448_s9 = int_to_ptr.hbm [resolvable:$true] %s447_s9 }
  0x17   : > { %s585_s24 = scalar_lea.vmem %s687_s0, %s373_s21  ;;  %s449_s12 = scalar_lea.hbm %s448_s9, 192 }
  0x18   : > { %v162_v0 = vld [vmem:[%s585_s24 + $0x80] sm:$0xff]  ;;  %v163_v2 = vld [vmem:[%s585_s24 + $0x88] sm:$0xff]  ;;  %v164_v4 = vld [vmem:[%s585_s24 + $0x90] sm:$0xff]  ;;  %p450_p12 = scmp.ne.s32.totalorder %s448_s9, %s449_s12  ;;  %p454_p1 = scmp.lt.s32.totalorder %s448_s9, %s688_s1 }
  0x19   : > { %v146_v1 = vld [vmem:[%s585_s24] sm:$0xff]  ;;  %210 = vxpose.xlu1.b32.start [1/16] (narrow) %v162_v0, 96  ;;  %v147_v3 = vld [vmem:[%s585_s24 + $0x8] sm:$0xff]  ;;  %v148_v5 = vld [vmem:[%s585_s24 + $0x10] sm:$0xff]  ;;  %p455_p2 = scmp.lt.s32.totalorder %s453_s17, %s449_s12 }
  0x1a   : > { %178 = vxpose.xlu0.b32.start [1/16] (narrow) %v146_v1, 96  ;;  %v165_v6 = vld [vmem:[%s585_s24 + $0x98] sm:$0xff]  ;;  %v166_v8 = vld [vmem:[%s585_s24 + $0xa0] sm:$0xff]  ;;  %v167_v10 = vld [vmem:[%s585_s24 + $0xa8] sm:$0xff]  ;;  %p451_p13 = pnand %p450_p12, %p565_p4 }
  0x1b   : > { %v149_v7 = vld [vmem:[%s585_s24 + $0x18] sm:$0xff]  ;;  %v150_v9 = vld [vmem:[%s585_s24 + $0x20] sm:$0xff]  ;;  %v151_v11 = vld [vmem:[%s585_s24 + $0x28] sm:$0xff]  ;;  %p456_p3 = por %p455_p2, %p454_p1 }
  0x1c   : > { %v168_v12 = vld [vmem:[%s585_s24 + $0xb0] sm:$0xff]  ;;  %v169_v14 = vld [vmem:[%s585_s24 + $0xb8] sm:$0xff]  ;;  %v170_v16 = vld [vmem:[%s585_s24 + $0xc0] sm:$0xff]  ;;  %p452_p0 = pneg %p451_p13 }
  0x1d   : > { %v152_v13 = vld [vmem:[%s585_s24 + $0x30] sm:$0xff]  ;;  %v153_v15 = vld [vmem:[%s585_s24 + $0x38] sm:$0xff]  ;;  %v154_v17 = vld [vmem:[%s585_s24 + $0x40] sm:$0xff] }
  0x1e   : > { %v171_v18 = vld [vmem:[%s585_s24 + $0xc8] sm:$0xff]  ;;  %v172_v20 = vld [vmem:[%s585_s24 + $0xd0] sm:$0xff]  ;;  %v173_v22 = vld [vmem:[%s585_s24 + $0xd8] sm:$0xff]  ;;  %p457_p5 = pnand %p456_p3, %p452_p0 }
  0x1f   : > { %v155_v19 = vld [vmem:[%s585_s24 + $0x48] sm:$0xff]  ;;  %v156_v21 = vld [vmem:[%s585_s24 + $0x50] sm:$0xff]  ;;  %v157_v23 = vld [vmem:[%s585_s24 + $0x58] sm:$0xff] }
  0x20   : > { %v174_v24 = vld [vmem:[%s585_s24 + $0xe0] sm:$0xff]  ;;  %v175_v26 = vld [vmem:[%s585_s24 + $0xe8] sm:$0xff]  ;;  %v176_v28 = vld [vmem:[%s585_s24 + $0xf0] sm:$0xff] }
  0x21   : > { %211 = vxpose.xlu1.b32.cont [2/16] (narrow) %v163_v2, 96  ;;  %v158_v25 = vld [vmem:[%s585_s24 + $0x60] sm:$0xff]  ;;  %v159_v27 = vld [vmem:[%s585_s24 + $0x68] sm:$0xff]  ;;  %v160_v29 = vld [vmem:[%s585_s24 + $0x70] sm:$0xff] }
  0x22   : > { %179 = vxpose.xlu0.b32.cont [2/16] (narrow) %v147_v3, 96  ;;  %v177_v30 = vld [vmem:[%s585_s24 + $0xf8] sm:$0xff] }
  0x23   : > { %v161_v31 = vld [vmem:[%s585_s24 + $0x78] sm:$0xff] }
  0x29   : > { %212 = vxpose.xlu1.b32.cont [3/16] (narrow) %v164_v4, 96 }
  0x2a   : > { %180 = vxpose.xlu0.b32.cont [3/16] (narrow) %v148_v5, 96 }
  0x31   : > { %213 = vxpose.xlu1.b32.cont [4/16] (narrow) %v165_v6, 96 }
  0x32   : > { %181 = vxpose.xlu0.b32.cont [4/16] (narrow) %v149_v7, 96 }
  0x39   : > { %214 = vxpose.xlu1.b32.cont [5/16] (narrow) %v166_v8, 96 }
  0x3a   : > { %182 = vxpose.xlu0.b32.cont [5/16] (narrow) %v150_v9, 96 }
  0x41   : > { %215 = vxpose.xlu1.b32.cont [6/16] (narrow) %v167_v10, 96 }
  0x42   : > { %183 = vxpose.xlu0.b32.cont [6/16] (narrow) %v151_v11, 96 }
  0x49   : > { %216 = vxpose.xlu1.b32.cont [7/16] (narrow) %v168_v12, 96 }
  0x4a   : > { %184 = vxpose.xlu0.b32.cont [7/16] (narrow) %v152_v13, 96 }
  0x51   : > { %217 = vxpose.xlu1.b32.cont [8/16] (narrow) %v169_v14, 96 }
  0x52   : > { %185 = vxpose.xlu0.b32.cont [8/16] (narrow) %v153_v15, 96 }
  0x59   : > { %218 = vxpose.xlu1.b32.cont [9/16] (narrow) %v170_v16, 96 }
  0x5a   : > { %186 = vxpose.xlu0.b32.cont [9/16] (narrow) %v154_v17, 96 }
  0x61   : > { %219 = vxpose.xlu1.b32.cont [10/16] (narrow) %v171_v18, 96 }
  0x62   : > { %187 = vxpose.xlu0.b32.cont [10/16] (narrow) %v155_v19, 96 }
  0x69   : > { %220 = vxpose.xlu1.b32.cont [11/16] (narrow) %v172_v20, 96 }
  0x6a   : > { %188 = vxpose.xlu0.b32.cont [11/16] (narrow) %v156_v21, 96 }
  0x71   : > { %221 = vxpose.xlu1.b32.cont [12/16] (narrow) %v173_v22, 96 }
  0x72   : > { %189 = vxpose.xlu0.b32.cont [12/16] (narrow) %v157_v23, 96 }
  0x79   : > { %222 = vxpose.xlu1.b32.cont [13/16] (narrow) %v174_v24, 96 }
  0x7a   : > { %190 = vxpose.xlu0.b32.cont [13/16] (narrow) %v158_v25, 96 }
  0x81   : > { %223 = vxpose.xlu1.b32.cont [14/16] (narrow) %v175_v26, 96 }
  0x82   : > { %191 = vxpose.xlu0.b32.cont [14/16] (narrow) %v159_v27, 96 }
  0x89   : > { %224 = vxpose.xlu1.b32.cont [15/16] (narrow) %v176_v28, 96 }
  0x8a   : > { %192 = vxpose.xlu0.b32.cont [15/16] (narrow) %v160_v29, 96 }
  0x91   : > { %225 = vxpose.xlu1.b32.end [16/16] (narrow) %v177_v30, 96 }
  0x92   : > { %193 = vxpose.xlu0.b32.end [16/16] (narrow) %v161_v31, 96 }
  0xbd   : > { %v226_v32 = vpop.trf.xlu1 }
  0xbe   : > { %v194_v33 = vpop.trf.xlu0  ;;  %243 = vst [vmem:[%s622_s27 + $0x8] sm:$0xff] %v226_v32 }
  0xbf   : > { %242 = vst [vmem:[%s622_s27] sm:$0xff] %v194_v33 }
  0xc5   : > { %v227_v34 = vpop.trf.xlu1 }
  0xc6   : > { %v195_v35 = vpop.trf.xlu0  ;;  %245 = vst [vmem:[%s622_s27 + $0x18] sm:$0xff] %v227_v34 }
  0xc7   : > { %244 = vst [vmem:[%s622_s27 + $0x10] sm:$0xff] %v195_v35 }
  0xcd   : > { %v228_v36 = vpop.trf.xlu1 }
  0xce   : > { %v196_v37 = vpop.trf.xlu0  ;;  %247 = vst [vmem:[%s622_s27 + $0x28] sm:$0xff] %v228_v36 }
  0xcf   : > { %246 = vst [vmem:[%s622_s27 + $0x20] sm:$0xff] %v196_v37 }
  0xd5   : > { %v229_v38 = vpop.trf.xlu1 }
  0xd6   : > { %v197_v39 = vpop.trf.xlu0  ;;  %249 = vst [vmem:[%s622_s27 + $0x38] sm:$0xff] %v229_v38 }
  0xd7   : > { %248 = vst [vmem:[%s622_s27 + $0x30] sm:$0xff] %v197_v39 }
  0xdd   : > { %v230_v40 = vpop.trf.xlu1 }
  0xde   : > { %v198_v41 = vpop.trf.xlu0  ;;  %251 = vst [vmem:[%s622_s27 + $0x48] sm:$0xff] %v230_v40 }
  0xdf   : > { %250 = vst [vmem:[%s622_s27 + $0x40] sm:$0xff] %v198_v41 }
  0xe5   : > { %v231_v42 = vpop.trf.xlu1 }
  0xe6   : > { %v199_v43 = vpop.trf.xlu0  ;;  %253 = vst [vmem:[%s622_s27 + $0x58] sm:$0xff] %v231_v42 }
  0xe7   : > { %252 = vst [vmem:[%s622_s27 + $0x50] sm:$0xff] %v199_v43 }
  0xed   : > { %v232_v44 = vpop.trf.xlu1 }
  0xee   : > { %v200_v45 = vpop.trf.xlu0  ;;  %255 = vst [vmem:[%s622_s27 + $0x68] sm:$0xff] %v232_v44 }
  0xef   : > { %254 = vst [vmem:[%s622_s27 + $0x60] sm:$0xff] %v200_v45 }
  0xf5   : > { %v233_v46 = vpop.trf.xlu1 }
  0xf6   : > { %v201_v47 = vpop.trf.xlu0  ;;  %257 = vst [vmem:[%s622_s27 + $0x78] sm:$0xff] %v233_v46 }
  0xf7   : > { %256 = vst [vmem:[%s622_s27 + $0x70] sm:$0xff] %v201_v47 }
  0xfd   : > { %v234_v48 = vpop.trf.xlu1 }
  0xfe   : > { %v202_v49 = vpop.trf.xlu0  ;;  %259 = vst [vmem:[%s622_s27 + $0x88] sm:$0xff] %v234_v48 }
  0xff   : > { %258 = vst [vmem:[%s622_s27 + $0x80] sm:$0xff] %v202_v49 }
 0x105   : > { %v235_v50 = vpop.trf.xlu1 }
 0x106   : > { %v203_v51 = vpop.trf.xlu0  ;;  %261 = vst [vmem:[%s622_s27 + $0x98] sm:$0xff] %v235_v50 }
 0x107   : > { %260 = vst [vmem:[%s622_s27 + $0x90] sm:$0xff] %v203_v51 }
 0x10d   : > { %v236_v52 = vpop.trf.xlu1 }
 0x10e   : > { %v204_v53 = vpop.trf.xlu0  ;;  %263 = vst [vmem:[%s622_s27 + $0xa8] sm:$0xff] %v236_v52 }
 0x10f   : > { %262 = vst [vmem:[%s622_s27 + $0xa0] sm:$0xff] %v204_v53 }
 0x115   : > { %v237_v54 = vpop.trf.xlu1 }
 0x116   : > { %v205_v55 = vpop.trf.xlu0  ;;  %265 = vst [vmem:[%s622_s27 + $0xb8] sm:$0xff] %v237_v54 }
 0x117   : > { %264 = vst [vmem:[%s622_s27 + $0xb0] sm:$0xff] %v205_v55 }
 0x118   : > { %460 = shalt.err (!%p457_p5)
}
 0x119   : > { %s513_s22 = smov 256   ;;  %s514_s23 = smov 16  }
 0x11a   : > { %376 = dma.vmem_to_hbm [thread:$0]  (%p565_p4), %s282_s3, 3072, %s284_s4, %s267_s5, %s513_s22, %s513_s22, %s514_s23  }
 0x11b PF: > { %p382_p6 = scmp.ge.s32.totalorder %s511_s11, 2  ;;  %s298_s24 = sand.u32 1, %s491_s6  }
 0x11c   : > { %s299_s25 = scalar_lea.sflag [#allocation3], %s298_s24 }
 0x11d   : > { %p379_p7 = pnand %p382_p6, %p572_p8 }
 0x11f   : > { %p380_p9 = pneg %p379_p7 }
 0x121   : > { %486 = dma.done.wait (%p380_p9), %s299_s25, 3072  }
 0x122   : > { %488 = vsyncadd (%p380_p9), %s299_s25, 4294964224  ;;  %s14_s11 = sadd.s32 1, %s511_s11   ;;  %s691_s6 = smov %s495_s7 }
 0x123   : > { %p11_p10 = scmp.ge.s32.totalorder %s14_s11, 4   ;;  %s692_s7 = smov %s499_s8 }
 0x124   : > { %s693_s8 = smov %s578_s19  ;;  %s694_s9 = smov %s507_s10 }
 0x125   : > { %s695_s10 = smov %s697_s14  ;;  %13 = sbr.rel (!%p11_p10) target bundleno = 4 (0x4), region = 59 }
 0x12a   :  { %305 = vsyncpa [#allocation3], 1 }
 0x12b   :  { %307 = vsyncpa [#allocation3 + $0x1], 1 }

</bundles_post_ra>
